<compile_context>
chip_gen: v6e
topology: v6e:2x2x1
jax: 0.10.0
libtpu: 0.0.40
codegen_flags: <defaults>
</compile_context>

<pallas_src>
import functools

import jax
import jax.numpy as jnp
from jax import lax
from jax.experimental import pallas as pl
from jax.experimental.pallas import tpu as pltpu


# ---------------------------------------------------------------------------
# tiling helpers
# ---------------------------------------------------------------------------
def _pick_row_tile(M, target):
    """Largest tile <= target that divides M and is a multiple of 128 (else M)."""
    if M <= target:
        return M
    for cand in range(target - target % 128, 127, -128):
        if M % cand == 0:
            return cand
    # TODO(synk): proper remainder handling instead of one whole-axis block.
    return M


def _pick_d_slab(D, H, W, target_rows):
    """Slab depth d_blk with D % d_blk == 0 and RB = d_blk*H*W 128-aligned (or == M)."""
    hw = H * W
    feasible = [db for db in range(1, D + 1)
                if D % db == 0 and ((db * hw) % 128 == 0 or db == D)]
    under = [db for db in feasible if db * hw <= target_rows]
    return max(under) if under else min(feasible)


# ---------------------------------------------------------------------------
# Kernel 1: BN1 batch statistics.  Input viewed as (N*Cin, M), tiled over M
#           with an accumulator (reduction axis = grid axis, "arbitrary").
# ---------------------------------------------------------------------------
def bn1_stats_kernel(x_ref, sum_ref, sumsq_ref):
    i = pl.program_id(0)
    x = x_ref[...]                                        # (N*Cin, RT) f32
    ps = jnp.sum(x, axis=1, keepdims=True)
    pq = jnp.sum(x * x, axis=1, keepdims=True)

    @pl.when(i == 0)
    def _():
        sum_ref[...] = jnp.zeros_like(sum_ref)
        sumsq_ref[...] = jnp.zeros_like(sumsq_ref)

    sum_ref[...] += ps
    sumsq_ref[...] += pq


# ---------------------------------------------------------------------------
# Kernel 2: per (sample, d-slab)
#   (a) shortcut 3x3x3 conv on the raw (bf16) zero-padded input,
#   (b) fused preact BN+ReLU -> main 3x3x3 conv,
#   both via per-slab im2col + a single K = KCpad matmul, emitted CHANNEL-MAJOR,
#   plus per-sample per-channel sum / sum-of-squares of the (bf16-rounded) main
#   conv output, accumulated across slabs (feeds SE pool and BN2 batch stats).
# ---------------------------------------------------------------------------
def fused_conv_kernel(xpad_ref, scale1_ref, shift1_ref, w1_ref, ws_ref,
                      conv_ref, sc_ref, sum_ref, sumsq_ref,
                      ybf_ref, patch_ref, *, H, W, Cin, d_blk, KC):
    f32, bf16 = jnp.float32, jnp.bfloat16
    t = pl.program_id(1)
    n_t = pl.num_programs(1)
    RB = d_blk * H * W
    KCpad = patch_ref.shape[1]
    d0 = t * d_blk

    # pad columns of the contraction never get written by assemble(): zero them once
    # per (core, sample) so the zero-padded weight rows never meet VMEM garbage.
    if KCpad > KC:
        @pl.when(t == 0)
        def _():
            patch_ref[:, KC:] = jnp.zeros((RB, KCpad - KC), bf16)

    def assemble(load_window):
        # im2col column order (kd, kh, kw, cin) matches the weight reshape.
        # TODO(synk): each tap store is only Cin lanes wide (masked vst); at realistic
        # Cin, fold (kw, cin) into one wider strip store to keep the vst slot fed.
        idx = 0
        for kd in range(3):
            for kh in range(3):
                for kw in range(3):
                    win = load_window(kd, kh, kw)          # (d_blk, H, W, Cin) bf16
                    patch_ref[:, idx * Cin:(idx + 1) * Cin] = win.reshape(RB, Cin)
                    idx += 1

    # ---- (a) projection-shortcut conv straight from the bf16 padded input ----
    assemble(lambda kd, kh, kw: xpad_ref[pl.ds(d0 + kd, d_blk),
                                         pl.ds(kh, H), pl.ds(kw, W), :])
    sc = lax.dot_general(ws_ref[...], patch_ref[...],
                         dimension_numbers=(((1,), (1,)), ((), ())),
                         preferred_element_type=f32)       # (Co, RB) channel-major
    sc_ref[...] = sc

    # ---- preact BN + ReLU into the slab scratch -------------------------------
    # Base copy re-establishes the exact-zero conv halo (global padding of x).
    ybf_ref[...] = xpad_ref[pl.ds(d0, d_blk + 2), :, :, :]

    def bn_relu_plane(lo, size):
        v = xpad_ref[pl.ds(d0 + lo, size), pl.ds(1, H), pl.ds(1, W), :].astype(f32)
        pre = jnp.maximum(v * scale1_ref[0] + shift1_ref[0], 0.0)
        ybf_ref[lo:lo + size, 1:H + 1, 1:W + 1, :] = pre.astype(bf16)

    bn_relu_plane(1, d_blk)              # planes that are always globally interior

    @pl.when(t > 0)
    def _():
        bn_relu_plane(0, 1)              # leading halo plane holds neighbour-slab data

    @pl.when(t < n_t - 1)
    def _():
        bn_relu_plane(d_blk + 1, 1)      # trailing halo plane holds neighbour-slab data

    # ---- (b) main conv + stats of the bf16-rounded values ---------------------
    assemble(lambda kd, kh, kw: ybf_ref[pl.ds(kd, d_blk),
                                        pl.ds(kh, H), pl.ds(kw, W), :])
    o = lax.dot_general(w1_ref[...], patch_ref[...],
                        dimension_numbers=(((1,), (1,)), ((), ())),
                        preferred_element_type=f32)        # (E, RB) channel-major
    ob = o.astype(bf16)
    conv_ref[...] = ob
    of = ob.astype(f32)                                    # stats match what pass 3 sees
    ps = jnp.sum(of, axis=1, keepdims=True)                # (E, 1)
    pq = jnp.sum(of * of, axis=1, keepdims=True)

    @pl.when(t == 0)
    def _():
        sum_ref[...] = jnp.zeros_like(sum_ref)
        sumsq_ref[...] = jnp.zeros_like(sumsq_ref)

    sum_ref[...] += ps
    sumsq_ref[...] += pq


# ---------------------------------------------------------------------------
# Kernel 3: (SE gate * BN2 scale) + 1x1x1 pointwise conv + folded BN2-shift
#           bias + residual (shortcut-conv) add.  Channel-major, lane = spatial.
# ---------------------------------------------------------------------------
def pw_residual_kernel(conv_ref, sc_ref, a_ref, wp_ref, bout_ref, out_ref):
    f32, bf16 = jnp.float32, jnp.bfloat16
    y = (conv_ref[...].astype(f32) * a_ref[...]).astype(bf16)     # (E, R3)
    o = jnp.dot(wp_ref[...], y, preferred_element_type=f32)       # (Co, R3)
    out_ref[...] = o + bout_ref[...] + sc_ref[...]


# ---------------------------------------------------------------------------
# Wrapper: PyTorch NCDHW in / NCDHW out.
# ---------------------------------------------------------------------------
def fused_mbconv_forward(x_ncdhw, p, eps=1e-5):
    f32, bf16 = jnp.float32, jnp.bfloat16
    x_ncdhw = x_ncdhw.astype(f32)
    N, Cin, D, H, W = x_ncdhw.shape
    E = p["w1"].shape[0]                   # expanded channels
    Co = p["wp"].shape[0]                  # output channels
    M = D * H * W
    KC = 27 * Cin
    KCpad = ((KC + 127) // 128) * 128      # pad contraction depth to a full lane tile
    Dp, Hp, Wp = D + 2, H + 2, W + 2

    # ~256 output rows per pass-2 grid step keeps VMEM small and gives the pipeline
    # several steps; raise toward 512-1024 on v6e (128 MiB VMEM), keep low on v7x.
    d_blk = _pick_d_slab(D, H, W, target_rows=256)
    RB = d_blk * H * W
    n_dblk = D // d_blk
    R3 = _pick_row_tile(M, 2048)           # pass-3 spatial (lane) tile
    RT = _pick_row_tile(M, 4096)           # pass-1 spatial tile

    # ---- pass 1: BN1 batch statistics (tiled reduction over the spatial axis) ----
    x_rows = x_ncdhw.reshape(N * Cin, M)
    s_nc, q_nc = pl.pallas_call(
        bn1_stats_kernel,
        out_shape=(jax.ShapeDtypeStruct((N * Cin, 1), f32),
                   jax.ShapeDtypeStruct((N * Cin, 1), f32)),
        grid_spec=pltpu.PrefetchScalarGridSpec(
            num_scalar_prefetch=0, grid=(M // RT,),
            in_specs=[pl.BlockSpec((N * Cin, RT), lambda i: (0, i))],
            out_specs=[pl.BlockSpec((N * Cin, 1), lambda i: (0, 0)),
                       pl.BlockSpec((N * Cin, 1), lambda i: (0, 0))]),
        compiler_params=pltpu.CompilerParams(
            dimension_semantics=("arbitrary",),
            vmem_limit_bytes=32 * 1024 * 1024),
    )(x_rows)

    cnt1 = float(N * M)
    s1 = s_nc.reshape(N, Cin).sum(axis=0)
    q1 = q_nc.reshape(N, Cin).sum(axis=0)
    mean1 = s1 / cnt1
    # TODO(synk): E[x^2]-mean^2 is cancellation-prone at production N*M; use a shifted
    # two-pass / Welford formulation there.
    var1 = jnp.maximum(q1 / cnt1 - mean1 * mean1, 0.0)
    inv1 = lax.rsqrt(var1 + eps)
    scale1 = (p["bn1_g"] * inv1).reshape(1, Cin).astype(f32)
    shift1 = (p["bn1_b"] - mean1 * p["bn1_g"] * inv1).reshape(1, Cin).astype(f32)

    # ---- weights: output-channel-major im2col layout, K padded to KCpad ----------
    w1t = jnp.transpose(p["w1"], (0, 2, 3, 4, 1)).reshape(E, KC)
    w1t = jnp.pad(w1t, ((0, 0), (0, KCpad - KC))).astype(bf16)
    wst = jnp.transpose(p["ws"], (0, 2, 3, 4, 1)).reshape(Co, KC)
    wst = jnp.pad(wst, ((0, 0), (0, KCpad - KC))).astype(bf16)

    # channels-last, zero-padded, bf16 input (halves HBM read and resident VMEM).
    x_cl = jnp.transpose(x_ncdhw, (0, 2, 3, 4, 1))
    xpad = jnp.pad(x_cl, ((0, 0), (1, 1), (1, 1), (1, 1), (0, 0))).astype(bf16)

    # ---- pass 2: both 3x3x3 convs + per-sample channel stats (channel-major) -----
    conv1, sc, csum, csq = pl.pallas_call(
        functools.partial(fused_conv_kernel, H=H, W=W, Cin=Cin, d_blk=d_blk, KC=KC),
        out_shape=(
            jax.ShapeDtypeStruct((N, E, M), bf16),     # main conv  (pre-SE/BN2)
            jax.ShapeDtypeStruct((N, Co, M), f32),     # shortcut conv
            jax.ShapeDtypeStruct((N, E, 1), f32),      # per-sample channel sum
            jax.ShapeDtypeStruct((N, E, 1), f32),      # per-sample channel sumsq
        ),
        grid_spec=pltpu.PrefetchScalarGridSpec(
            num_scalar_prefetch=0, grid=(N, n_dblk),
            in_specs=[
                pl.BlockSpec((None, Dp, Hp, Wp, Cin), lambda n, t: (n, 0, 0, 0, 0)),
                pl.BlockSpec((1, Cin), lambda n, t: (0, 0)),
                pl.BlockSpec((1, Cin), lambda n, t: (0, 0)),
                pl.BlockSpec((E, KCpad), lambda n, t: (0, 0)),
                pl.BlockSpec((Co, KCpad), lambda n, t: (0, 0)),
            ],
            out_specs=[
                pl.BlockSpec((None, E, RB), lambda n, t: (n, 0, t)),
                pl.BlockSpec((None, Co, RB), lambda n, t: (n, 0, t)),
                pl.BlockSpec((None, E, 1), lambda n, t: (n, 0, 0)),
                pl.BlockSpec((None, E, 1), lambda n, t: (n, 0, 0)),
            ],
            scratch_shapes=[
                pltpu.VMEM((d_blk + 2, Hp, Wp, Cin), bf16),   # preact slab (with halo)
                pltpu.VMEM((RB, KCpad), bf16),                # per-slab im2col patches
            ]),
        compiler_params=pltpu.CompilerParams(
            dimension_semantics=("parallel", "arbitrary"),
            vmem_limit_bytes=64 * 1024 * 1024),
    )(xpad, scale1, shift1, w1t, wst)

    # ---- SE gate + BN2 scale/shift: (N, E)-sized math, done in the wrapper -------
    cs = csum[:, :, 0]                                    # (N, E)
    cq = csq[:, :, 0]
    squeeze = cs / float(M)                               # global average pool
    r_ch = p["se_w1"].shape[0]
    se_h = jnp.maximum(squeeze @ p["se_w1"].reshape(r_ch, E).T + p["se_b1"], 0.0)
    gate = jax.nn.sigmoid(se_h @ p["se_w2"].reshape(E, r_ch).T + p["se_b2"])   # (N, E)

    cnt2 = float(N * M)
    mean2 = jnp.sum(gate * cs, axis=0) / cnt2
    var2 = jnp.maximum(jnp.sum(gate * gate * cq, axis=0) / cnt2 - mean2 * mean2, 0.0)
    inv2 = lax.rsqrt(var2 + eps)
    scale2 = p["bn2_g"] * inv2
    shift2 = p["bn2_b"] - mean2 * scale2

    wp_m = p["wp"].reshape(Co, E).astype(f32)
    a_cm = (gate * scale2[None, :]).astype(f32).reshape(N, E, 1)      # SE*BN2 scale
    bout = (wp_m @ shift2).reshape(Co, 1).astype(f32)                 # folded BN2 shift
    wp_bf = wp_m.astype(bf16)

    # ---- pass 3: SE*BN2 scale + pointwise conv + bias + residual add -------------
    out_cm = pl.pallas_call(
        pw_residual_kernel,
        out_shape=jax.ShapeDtypeStruct((N, Co, M), f32),
        grid_spec=pltpu.PrefetchScalarGridSpec(
            num_scalar_prefetch=0, grid=(N, M // R3),
            in_specs=[
                pl.BlockSpec((None, E, R3), lambda n, r: (n, 0, r)),
                pl.BlockSpec((None, Co, R3), lambda n, r: (n, 0, r)),
                pl.BlockSpec((None, E, 1), lambda n, r: (n, 0, 0)),
                pl.BlockSpec((Co, E), lambda n, r: (0, 0)),
                pl.BlockSpec((Co, 1), lambda n, r: (0, 0)),
            ],
            out_specs=pl.BlockSpec((None, Co, R3), lambda n, r: (n, 0, r))),
        compiler_params=pltpu.CompilerParams(
            dimension_semantics=("parallel", "parallel"),
            vmem_limit_bytes=64 * 1024 * 1024),
    )(conv1, sc, a_cm, wp_bf, bout)

    # channel-major (N, Co, M) is already NCDHW after a free reshape: no epilogue pass.
    return out_cm.reshape(N, Co, D, H, W)


# ---------------------------------------------------------------------------
# Reference (plain JAX, f32) mirroring the PyTorch module in training mode.
# ---------------------------------------------------------------------------
def fused_mbconv_reference(x, p, eps=1e-5):
    f32 = jnp.float32

    def bn(z, g, b):
        mean = z.mean(axis=(0, 2, 3, 4), keepdims=True)
        var = ((z - mean) ** 2).mean(axis=(0, 2, 3, 4), keepdims=True)
        zh = (z - mean) / jnp.sqrt(var + eps)
        return g.reshape(1, -1, 1, 1, 1) * zh + b.reshape(1, -1, 1, 1, 1)

    x = x.astype(f32)
    y1 = jnp.maximum(bn(x, p["bn1_g"], p["bn1_b"]), 0.0)
    c1 = lax.conv_general_dilated(
        y1, p["w1"].astype(f32), (1, 1, 1), ((1, 1), (1, 1), (1, 1)),
        dimension_numbers=("NCDHW", "OIDHW", "NCDHW"))
    E = c1.shape[1]
    r = p["se_w1"].shape[0]
    sq = c1.mean(axis=(2, 3, 4))                                   # (N, E)
    h = jnp.maximum(sq @ p["se_w1"].reshape(r, E).T + p["se_b1"], 0.0)
    gate = jax.nn.sigmoid(h @ p["se_w2"].reshape(E, r).T + p["se_b2"])
    y3 = c1 * gate[:, :, None, None, None]
    y4 = bn(y3, p["bn2_g"], p["bn2_b"])
    Co = p["wp"].shape[0]
    y5 = jnp.einsum("nedhw,oe->nodhw", y4, p["wp"].reshape(Co, E))
    sc = lax.conv_general_dilated(
        x, p["ws"].astype(f32), (1, 1, 1), ((1, 1), (1, 1), (1, 1)),
        dimension_numbers=("NCDHW", "OIDHW", "NCDHW"))
    return y5 + sc                                                 # DropPath(p=0) = id


if __name__ == "__main__":
    key = jax.random.PRNGKey(0)
    ks = jax.random.split(key, 12)

    N, Cin, Co = 2, 4, 8          # in_ch != out_ch -> projection shortcut path
    D = H = W = 8
    expansion, ratio = 4, 4
    E = expansion * Cin           # 16
    Er = E // ratio               # 4

    x = jax.random.normal(ks[0], (N, Cin, D, H, W), jnp.float32)
    p = {
        "bn1_g": 1.0 + 0.1 * jax.random.normal(ks[1], (Cin,), jnp.float32),
        "bn1_b": 0.1 * jax.random.normal(ks[2], (Cin,), jnp.float32),
        # PyTorch Conv3d weight layout: (out_ch, in_ch, kd, kh, kw)
        "w1":    0.1 * jax.random.normal(ks[3], (E, Cin, 3, 3, 3), jnp.float32),
        "se_w1": 0.3 * jax.random.normal(ks[4], (Er, E, 1, 1, 1), jnp.float32),
        "se_b1": 0.3 * jax.random.normal(ks[5], (Er,), jnp.float32),
        "se_w2": 0.3 * jax.random.normal(ks[6], (E, Er, 1, 1, 1), jnp.float32),
        "se_b2": 0.5 * jax.random.normal(ks[7], (E,), jnp.float32),
        "bn2_g": 1.0 + 0.1 * jax.random.normal(ks[8], (E,), jnp.float32),
        "bn2_b": 0.1 * jax.random.normal(ks[9], (E,), jnp.float32),
        "wp":    0.1 * jax.random.normal(ks[10], (Co, E, 1, 1, 1), jnp.float32),
        "ws":    0.1 * jax.random.normal(ks[11], (Co, Cin, 3, 3, 3), jnp.float32),
    }

    out = jax.block_until_ready(fused_mbconv_forward(x, p))
    ref = jax.block_until_ready(fused_mbconv_reference(x, p))

    assert out.shape == (N, Co, D, H, W)
    # bf16 matmul operands (f32 accumulation) -> loosened tolerance vs f32 ref.
    assert bool(jnp.allclose(out, ref, atol=5e-2, rtol=5e-2)), "mismatch vs reference"

    print("KERNEL_OK")
</pallas_src>

<mosaic_0001>
module attributes {stable_mosaic.version = 11 : i64} {
  func.func @bn1_stats_kernel(%arg0: i32, %arg1: memref<8x512xf32, #tpu.memory_space<vmem>>, %arg2: memref<8x1xf32, #tpu.memory_space<vmem>>, %arg3: memref<8x1xf32, #tpu.memory_space<vmem>>) attributes {dimension_semantics = [#tpu.dimension_semantics<arbitrary>], iteration_bounds = array<i64: 1>, scalar_prefetch = 0 : i64, scratch_operands = 0 : i64, tpu.core_type = #tpu.core_type<tc>, window_params = [{transform_indices = @transform_0, window_bounds = array<i64: 8, 512>}, {pipeline_mode = #tpu.pipeline_mode<synchronous>, transform_indices = @transform_1, window_bounds = array<i64: 8, 1>}, {pipeline_mode = #tpu.pipeline_mode<synchronous>, transform_indices = @transform_2, window_bounds = array<i64: 8, 1>}]} {
    %c0 = arith.constant 0 : index
    %c0_0 = arith.constant 0 : index
    %0 = vector.load %arg1[%c0, %c0_0] : memref<8x512xf32, #tpu.memory_space<vmem>>, vector<8x512xf32>
    %cst = arith.constant dense<0.000000e+00> : vector<8xf32>
    %1 = vector.multi_reduction <add>, %0, %cst [1] : vector<8x512xf32> to vector<8xf32>
    %2 = vector.shape_cast %1 : vector<8xf32> to vector<8x1xf32>
    %3 = arith.mulf %0, %0 : vector<8x512xf32>
    %cst_1 = arith.constant dense<0.000000e+00> : vector<8xf32>
    %4 = vector.multi_reduction <add>, %3, %cst_1 [1] : vector<8x512xf32> to vector<8xf32>
    %5 = vector.shape_cast %4 : vector<8xf32> to vector<8x1xf32>
    %c0_i32 = arith.constant 0 : i32
    %6 = arith.cmpi eq, %arg0, %c0_i32 : i32
    %7 = arith.extui %6 : i1 to i32
    %c0_i32_2 = arith.constant 0 : i32
    %8 = arith.cmpi ne, %7, %c0_i32_2 : i32
    scf.if %8 {
      %cst_11 = arith.constant 0.000000e+00 : f32
      %15 = vector.broadcast %cst_11 : f32 to vector<8x1xf32>
      %c0_12 = arith.constant 0 : index
      %c0_13 = arith.constant 0 : index
      %16 = vector.load %arg2[%c0_12, %c0_13] : memref<8x1xf32, #tpu.memory_space<vmem>>, vector<8x1xf32>
      tpu.vector_store %arg2[%c0_12, %c0_13], %15 {strides = array<i32>} : memref<8x1xf32, #tpu.memory_space<vmem>>, vector<8x1xf32>,
      %cst_14 = arith.constant 0.000000e+00 : f32
      %17 = vector.broadcast %cst_14 : f32 to vector<8x1xf32>
      %c0_15 = arith.constant 0 : index
      %c0_16 = arith.constant 0 : index
      %18 = vector.load %arg3[%c0_15, %c0_16] : memref<8x1xf32, #tpu.memory_space<vmem>>, vector<8x1xf32>
      tpu.vector_store %arg3[%c0_15, %c0_16], %17 {strides = array<i32>} : memref<8x1xf32, #tpu.memory_space<vmem>>, vector<8x1xf32>,
    } else {
    }
    %c0_3 = arith.constant 0 : index
    %c0_4 = arith.constant 0 : index
    %9 = vector.load %arg2[%c0_3, %c0_4] : memref<8x1xf32, #tpu.memory_space<vmem>>, vector<8x1xf32>
    %10 = arith.addf %9, %2 : vector<8x1xf32>
    %c0_5 = arith.constant 0 : index
    %c0_6 = arith.constant 0 : index
    %11 = vector.load %arg2[%c0_5, %c0_6] : memref<8x1xf32, #tpu.memory_space<vmem>>, vector<8x1xf32>
    tpu.vector_store %arg2[%c0_5, %c0_6], %10 {strides = array<i32>} : memref<8x1xf32, #tpu.memory_space<vmem>>, vector<8x1xf32>,
    %c0_7 = arith.constant 0 : index
    %c0_8 = arith.constant 0 : index
    %12 = vector.load %arg3[%c0_7, %c0_8] : memref<8x1xf32, #tpu.memory_space<vmem>>, vector<8x1xf32>
    %13 = arith.addf %12, %5 : vector<8x1xf32>
    %c0_9 = arith.constant 0 : index
    %c0_10 = arith.constant 0 : index
    %14 = vector.load %arg3[%c0_9, %c0_10] : memref<8x1xf32, #tpu.memory_space<vmem>>, vector<8x1xf32>
    tpu.vector_store %arg3[%c0_9, %c0_10], %13 {strides = array<i32>} : memref<8x1xf32, #tpu.memory_space<vmem>>, vector<8x1xf32>,
    return
  }
  func.func @transform_0(%arg0: i32) -> (i32, i32) {
    %c0_i32 = arith.constant 0 : i32
    %c0_i32_0 = arith.constant 0 : i32
    return %c0_i32, %arg0 : i32, i32
  }
  func.func @transform_1(%arg0: i32) -> (i32, i32) {
    %c0_i32 = arith.constant 0 : i32
    %c0_i32_0 = arith.constant 0 : i32
    %c0_i32_1 = arith.constant 0 : i32
    return %c0_i32, %c0_i32_0 : i32, i32
  }
  func.func @transform_2(%arg0: i32) -> (i32, i32) {
    %c0_i32 = arith.constant 0 : i32
    %c0_i32_0 = arith.constant 0 : i32
    %c0_i32_1 = arith.constant 0 : i32
    return %c0_i32, %c0_i32_0 : i32, i32
  }
}

</mosaic_0001>

<bundles_post_ra>
// kernel: tpu_custom_call.1
= control target key start
LH: loop header
LB: loop body
LE: loop exit
PB: predicated region body
PF: predicated region fallthrough
CT: control target
= control target key end

     0   :  { %8 = vsyncpa [#allocation3], 0  ;;  %s87_s9 = smov [#allocation2]   ;;  %s129_s0 = inlined_call_operand.hbm [shape: f32[8,512], index: 0, kind: input, shape index: {}]   ;;  %s130_s1 = inlined_call_operand.vmem [shape: f32[8,1], index: 1, kind: output, shape index: {0}]   ;;  %s131_s2 = inlined_call_operand.vmem [shape: f32[8,1], index: 2, kind: output, shape index: {1}]  }
   0x1   :  { %s15_s10 = sshll.u32 %s87_s9, 4  ;;  %s16_s10 = int_to_ptr.vmem [resolvable:$true] %s15_s10 }
   0x2   :  { %s73_s11 = scalar_lea.vmem %s16_s10, 512  ;;  %p78_p1 = scmp.lt.s32.totalorder %s16_s10, %s16_s10 }
   0x3   :  { %p74_p0 = scmp.ne.s32.totalorder %s16_s10, %s73_s11  ;;  %p79_p2 = scmp.lt.s32.totalorder %s73_s11, %s73_s11 }
   0x5   :  { %p80_p3 = por %p79_p2, %p78_p1 }
   0x7   :  { %p81_p4 = pnand %p80_p3, %p74_p0 }
   0x9   :  { %84 = shalt.err (!%p81_p4)
}
   0xa   :  { %18 = dma.hbm_to_vmem [thread:$0]  %s129_s0, 512, %s16_s10, [#allocation3]  }
   0xb   :  { %85 = dma.done.wait [#allocation3], 512  }
   0xc   :  { %86 = vsyncadd [#allocation3], 4294966784  ;;  %vm44_vm0 = vcmask 7168   ;;  %v88_v0 = vmov 0.0   ;;  %v22_v1 = vld [vmem:[#allocation2] sm:$0xff]  ;;  %v23_v2 = vld [vmem:[#allocation2 + $0x8] sm:$0xff] }
   0xd   :  { %45 = vst.msk [vmem:[%s130_s1] sm:$0xff] %vm44_vm0, %v88_v0  ;;  %46 = vst.msk [vmem:[%s131_s2] sm:$0xff] %vm44_vm0, %v88_v0  ;;  %v24_v3 = vld [vmem:[#allocation2 + $0x10] sm:$0xff]  ;;  %v26_v4 = vadd.f32 %v23_v2, %v22_v1  ;;  %v31_v5 = vmul.f32 %v22_v1, %v22_v1  ;;  %v32_v6 = vmul.f32 %v23_v2, %v23_v2  ;;  %v25_v8 = vld [vmem:[#allocation2 + $0x18] sm:$0xff] }
   0xe   :  { %v33_v7 = vmul.f32 %v24_v3, %v24_v3  ;;  %v34_v10 = vmul.f32 %v25_v8, %v25_v8 }
   0xf   :  { %v27_v9 = vadd.f32 %v26_v4, %v24_v3  ;;  %v35_v11 = vadd.f32 %v32_v6, %v31_v5 }
  0x11   :  { %v28_v12 = vadd.f32 %v27_v9, %v25_v8  ;;  %v36_v13 = vadd.f32 %v35_v11, %v33_v7 }
  0x13   :  { %29 = vadd.xlane.f32.xlu0 %v28_v12  ;;  %v37_v14 = vadd.f32 %v36_v13, %v34_v10 }
  0x14   :  { %v47_v15 = vld [vmem:[%s130_s1] sm:$0xff] }
  0x15   :  { %v51_v18 = vld [vmem:[%s131_s2] sm:$0xff] }
  0x17   :  { %38 = vadd.xlane.f32.xlu0 %v37_v14 }
  0x9c   :  { %v30_v16 = vpop.xlane.xlu0 %29 }
  0x9d   :  { %v48_v17 = vadd.f32 %v47_v15, %v30_v16 }
  0x9f   :  { %50 = vst.msk [vmem:[%s130_s1] sm:$0xff] %vm44_vm0, %v48_v17 }
  0xa0   :  { %v39_v19 = vpop.xlane.xlu0 %38 }
  0xa1   :  { %v52_v20 = vadd.f32 %v51_v18, %v39_v19 }
  0xa3   :  { %53 = vst.msk [vmem:[%s131_s2] sm:$0xff] %vm44_vm0, %v52_v20 }
  0xa4   :  { %62 = vsyncpa [#allocation3], 1 }

</bundles_post_ra>
